<compile_context>
chip_gen: v7x
topology: tpu7x:2x2x1
jax: 0.10.0
libtpu: 0.0.40
codegen_flags: <defaults>
</compile_context>

<pallas_src>
import functools

import jax
import jax.numpy as jnp
from jax.experimental import pallas as pl
from jax.experimental.pallas import tpu as pltpu

NUM_CLASSES = 10
IN_FEATURES = 28 * 28          # 784
LANE_CLASSES = 128             # class dim padded to one full lane group
DEFAULT_TILE_N = 1024          # rows per grid step (<=1024 keeps v5e's 16 MiB
                               # default scoped VMEM happy; no 2048 tiles)


def _round_up(x, m):
    return ((x + m - 1) // m) * m


def _linear_kernel(x_ref, wt_ref, b_ref, o_ref):
    # x_ref:  (TN, 784)  f32  -- streamed batch tile (ragged last tile masked by Pallas)
    # wt_ref: (784, 128) bf16 -- resident transposed + zero-padded weight
    # b_ref:  (1, 128)   f32  -- resident zero-padded bias
    # o_ref:  (TN, 128)  f32  -- lane-dense output block
    x = x_ref[...].astype(jnp.bfloat16)          # cheap VPU cast, hides under the x DMA
    acc = jnp.dot(x, wt_ref[...], preferred_element_type=jnp.float32)  # native bf16 MXU pass
    o_ref[...] = acc + b_ref[...]


def prepare_params(weight, bias):
    """One-time parameter prep (hoisted out of the per-call path).

    weight: (NUM_CLASSES, 784) float32  (PyTorch nn.Linear layout)
    bias:   (NUM_CLASSES,)     float32
    returns (wt_pad, b_pad): (784, 128) bf16 and (1, 128) f32, zero beyond class 9.
    """
    wt = weight.T.astype(jnp.bfloat16)                                  # (784, 10)
    wt_pad = jnp.zeros((IN_FEATURES, LANE_CLASSES), jnp.bfloat16)
    wt_pad = wt_pad.at[:, :NUM_CLASSES].set(wt)
    b_pad = jnp.zeros((1, LANE_CLASSES), jnp.float32)
    b_pad = b_pad.at[0, :NUM_CLASSES].set(bias.astype(jnp.float32))
    return wt_pad, b_pad


@functools.partial(jax.jit, static_argnames=("tile_n",))
def baseline_forward(x_nchw, wt_pad, b_pad, *, tile_n=DEFAULT_TILE_N):
    """Pallas equivalent of BaseLine.forward (Flatten + Linear).

    x_nchw: (N, 1, 28, 28) float32
    wt_pad: (784, 128) bfloat16  (from prepare_params)
    b_pad:  (1, 128)   float32   (from prepare_params)
    returns (N, NUM_CLASSES) float32 logits
    """
    n = x_nchw.shape[0]
    # nn.Flatten (NCHW row-major). astype is a no-op for f32 inputs.
    # TODO(synk): for uint8/bf16 upstream data, stream the native dtype and
    # cast/scale inside the kernel (sublane multiple becomes 32 / 16).
    x_flat = x_nchw.reshape(n, IN_FEATURES).astype(jnp.float32)

    # Batch tile: multiple of 8 sublanes (f32), capped at tile_n. For n > 8,
    # force >= 2 grid steps so the parallel axis shards across both v7x TCs.
    tn = tile_n
    if n > 8:
        tn = min(tn, _round_up(pl.cdiv(n, 2), 8))
    tn = max(8, min(tn, _round_up(n, 8)))
    num_tiles = pl.cdiv(n, tn)                   # ragged last tile handled by Pallas

    cost = pl.CostEstimate(
        flops=2 * n * IN_FEATURES * LANE_CLASSES,
        transcendentals=0,
        bytes_accessed=(n * IN_FEATURES * 4          # x (f32)
                        + IN_FEATURES * LANE_CLASSES * 2   # weight (bf16)
                        + n * LANE_CLASSES * 4),     # out (f32)
    )

    out = pl.pallas_call(
        _linear_kernel,
        out_shape=jax.ShapeDtypeStruct((n, LANE_CLASSES), jnp.float32),
        grid_spec=pltpu.PrefetchScalarGridSpec(
            num_scalar_prefetch=0,
            grid=(num_tiles,),
            in_specs=[
                pl.BlockSpec((tn, IN_FEATURES), lambda i: (i, 0)),            # streamed x tile
                pl.BlockSpec((IN_FEATURES, LANE_CLASSES), lambda i: (0, 0)),  # resident weight
                pl.BlockSpec((1, LANE_CLASSES), lambda i: (0, 0)),            # resident bias
            ],
            out_specs=pl.BlockSpec((tn, LANE_CLASSES), lambda i: (i, 0)),
        ),
        compiler_params=pltpu.CompilerParams(
            dimension_semantics=("parallel",),       # default scoped VMEM is plenty; no limit override
        ),
        cost_estimate=cost,
    )(x_flat, wt_pad, b_pad)

    # Only the padded (zeroed) class lanes are sliced off; batch dim is exact.
    return out[:, :NUM_CLASSES]


def init_params(key):
    # Deterministic init matching nn.Linear shapes: W (10, 784), b (10,)
    kw, kb = jax.random.split(key)
    bound = 1.0 / jnp.sqrt(float(IN_FEATURES))
    weight = jax.random.uniform(
        kw, (NUM_CLASSES, IN_FEATURES), jnp.float32, minval=-bound, maxval=bound
    )
    bias = jax.random.uniform(
        kb, (NUM_CLASSES,), jnp.float32, minval=-bound, maxval=bound
    )
    return weight, bias


if __name__ == "__main__":
    key = jax.random.PRNGKey(0)
    kx, kx2, kp = jax.random.split(key, 3)

    weight, bias = init_params(kp)
    wt_pad, b_pad = prepare_params(weight, bias)   # hoisted param prep (once)

    def ref_logits(x):
        # Reference with the same bf16 operand rounding + f32 accumulation.
        xb = x.reshape(x.shape[0], -1).astype(jnp.bfloat16).astype(jnp.float32)
        wb = weight.astype(jnp.bfloat16).astype(jnp.float32)
        return xb @ wb.T + bias

    # Small MNIST-like batch: (N=8, C=1, H=28, W=28) -- single-tile path.
    x_small = jax.random.normal(kx, (8, 1, 28, 28), dtype=jnp.float32)
    logits_small = jax.block_until_ready(baseline_forward(x_small, wt_pad, b_pad))
    assert logits_small.shape == (8, NUM_CLASSES)
    assert jnp.allclose(logits_small, ref_logits(x_small), atol=2e-2, rtol=2e-2)

    # Non-divisible batch exercises the 2-step grid + ragged last block path
    # (tn = 56, tiles of 56 and 44 rows, no wrapper-side padding copy).
    x_ragged = jax.random.normal(kx2, (100, 1, 28, 28), dtype=jnp.float32)
    logits_ragged = jax.block_until_ready(baseline_forward(x_ragged, wt_pad, b_pad))
    assert logits_ragged.shape == (100, NUM_CLASSES)
    assert jnp.allclose(logits_ragged, ref_logits(x_ragged), atol=2e-2, rtol=2e-2)

    print("KERNEL_OK")
</pallas_src>

<mosaic_0001>
module attributes {stable_mosaic.version = 11 : i64} {
  func.func @_linear_kernel(%arg0: i32, %arg1: memref<8x784xf32, #tpu.memory_space<vmem>>, %arg2: memref<784x128xbf16, #tpu.memory_space<vmem>>, %arg3: memref<1x128xf32, #tpu.memory_space<vmem>>, %arg4: memref<8x128xf32, #tpu.memory_space<vmem>>) attributes {dimension_semantics = [#tpu.dimension_semantics<parallel>], iteration_bounds = array<i64: 1>, scalar_prefetch = 0 : i64, scratch_operands = 0 : i64, tpu.core_type = #tpu.core_type<tc>, window_params = [{transform_indices = @transform_0, window_bounds = array<i64: 8, 784>}, {pipeline_mode = #tpu.pipeline_mode<synchronous>, transform_indices = @transform_1, window_bounds = array<i64: 784, 128>}, {pipeline_mode = #tpu.pipeline_mode<synchronous>, transform_indices = @transform_2, window_bounds = array<i64: 1, 128>}, {transform_indices = @transform_3, window_bounds = array<i64: 8, 128>}]} {
    %c0 = arith.constant 0 : index
    %c0_0 = arith.constant 0 : index
    %0 = vector.load %arg1[%c0, %c0_0] : memref<8x784xf32, #tpu.memory_space<vmem>>, vector<8x784xf32>
    %1 = arith.truncf %0 : vector<8x784xf32> to vector<8x784xbf16>
    %c0_1 = arith.constant 0 : index
    %c0_2 = arith.constant 0 : index
    %2 = vector.load %arg2[%c0_1, %c0_2] : memref<784x128xbf16, #tpu.memory_space<vmem>>, vector<784x128xbf16>
    %cst = arith.constant dense<0.000000e+00> : vector<8x128xf32>
    %3 = tpu.matmul %1, %2, %cst {dimension_numbers = #tpu.dot_dimension_numbers<[1], [0], [0], [1], [0, 0, 1, 1], [], []>} : vector<8x784xbf16>, vector<784x128xbf16>, vector<8x128xf32> -> vector<8x128xf32>
    %c0_3 = arith.constant 0 : index
    %c0_4 = arith.constant 0 : index
    %4 = vector.load %arg3[%c0_3, %c0_4] : memref<1x128xf32, #tpu.memory_space<vmem>>, vector<1x128xf32>
    %5 = vector.broadcast %4 : vector<1x128xf32> to vector<8x128xf32>
    %6 = arith.addf %3, %5 : vector<8x128xf32>
    %c0_5 = arith.constant 0 : index
    %c0_6 = arith.constant 0 : index
    %7 = vector.load %arg4[%c0_5, %c0_6] : memref<8x128xf32, #tpu.memory_space<vmem>>, vector<8x128xf32>
    tpu.vector_store %arg4[%c0_5, %c0_6], %6 {strides = array<i32>} : memref<8x128xf32, #tpu.memory_space<vmem>>, vector<8x128xf32>,
    return
  }
  func.func @transform_0(%arg0: i32) -> (i32, i32) {
    %c0_i32 = arith.constant 0 : i32
    %c0_i32_0 = arith.constant 0 : i32
    return %arg0, %c0_i32 : i32, i32
  }
  func.func @transform_1(%arg0: i32) -> (i32, i32) {
    %c0_i32 = arith.constant 0 : i32
    %c0_i32_0 = arith.constant 0 : i32
    %c0_i32_1 = arith.constant 0 : i32
    return %c0_i32, %c0_i32_0 : i32, i32
  }
  func.func @transform_2(%arg0: i32) -> (i32, i32) {
    %c0_i32 = arith.constant 0 : i32
    %c0_i32_0 = arith.constant 0 : i32
    %c0_i32_1 = arith.constant 0 : i32
    return %c0_i32, %c0_i32_0 : i32, i32
  }
  func.func @transform_3(%arg0: i32) -> (i32, i32) {
    %c0_i32 = arith.constant 0 : i32
    %c0_i32_0 = arith.constant 0 : i32
    return %arg0, %c0_i32 : i32, i32
  }
}

</mosaic_0001>

<bundles_post_ra>
// kernel: baseline_forward.1
= control target key start
LH: loop header
LB: loop body
LE: loop exit
PB: predicated region body
PF: predicated region fallthrough
CT: control target
= control target key end

     0   :  { %v809_v44 = vmov 0.0   ;;  %vm810_vm0 = vmmov 0   ;;  %s1015_s0 = inlined_call_operand.vmem [shape: f32[8,784], index: 0, kind: input, shape index: {}]   ;;  %s1016_s1 = inlined_call_operand.vmem [shape: bf16[784,128], index: 1, kind: input, shape index: {}]   ;;  %s1017_s2 = inlined_call_operand.vmem [shape: f32[1,128], index: 2, kind: input, shape index: {}]   ;;  %s1018_s3 = inlined_call_operand.hbm [shape: f32[8,128], index: 3, kind: output, shape index: {}]  }
   0x1   :  { %v736_v0 = vld [vmem:[%s1016_s1 + $0x40] sm:$0xff]   ;;  %v740_v4 = vld [vmem:[%s1016_s1 + $0x48] sm:$0xff]   ;;  %v744_v8 = vld [vmem:[%s1016_s1 + $0x50] sm:$0xff]  }
   0x2   :  { %v737_v1 = vld [vmem:[%s1016_s1] sm:$0xff]   ;;  %659 = vmatprep.subr.bf16.mxu0 %v736_v0  ;;  %v741_v5 = vld [vmem:[%s1016_s1 + $0x8] sm:$0xff]   ;;  %v745_v9 = vld [vmem:[%s1016_s1 + $0x10] sm:$0xff]  }
   0x3   :  { %v738_v2 = vld [vmem:[%s1016_s1 + $0xc0] sm:$0xff]   ;;  %660 = vmatpush3.bf16.msra.mxu0 %v737_v1  ;;  %v742_v6 = vld [vmem:[%s1016_s1 + $0xc8] sm:$0xff]   ;;  %v746_v10 = vld [vmem:[%s1016_s1 + $0xd0] sm:$0xff]  }
   0x4   :  { %v739_v3 = vld [vmem:[%s1016_s1 + $0x80] sm:$0xff]   ;;  %681 = vmatprep.subr.bf16.mxu1 %v738_v2  ;;  %661 = vmatprep.subr.bf16.mxu0 %v740_v4  ;;  %v743_v7 = vld [vmem:[%s1016_s1 + $0x88] sm:$0xff]   ;;  %v747_v11 = vld [vmem:[%s1016_s1 + $0x90] sm:$0xff]  }
   0x5   :  { %682 = vmatpush3.bf16.msra.mxu1 %v739_v3  ;;  %v748_v12 = vld [vmem:[%s1016_s1 + $0x58] sm:$0xff]   ;;  %v752_v16 = vld [vmem:[%s1016_s1 + $0x60] sm:$0xff]   ;;  %v756_v20 = vld [vmem:[%s1016_s1 + $0x68] sm:$0xff]  }
   0x6   :  { %683 = vmatprep.subr.bf16.mxu1 %v742_v6  ;;  %v749_v13 = vld [vmem:[%s1016_s1 + $0x18] sm:$0xff]   ;;  %v753_v17 = vld [vmem:[%s1016_s1 + $0x20] sm:$0xff]   ;;  %v757_v21 = vld [vmem:[%s1016_s1 + $0x28] sm:$0xff]  }
   0x7   :  { %662 = vmatpush3.bf16.msra.mxu0 %v741_v5  ;;  %v750_v14 = vld [vmem:[%s1016_s1 + $0xd8] sm:$0xff]   ;;  %v754_v18 = vld [vmem:[%s1016_s1 + $0xe0] sm:$0xff]   ;;  %v758_v22 = vld [vmem:[%s1016_s1 + $0xe8] sm:$0xff]  }
   0x8   :  { %663 = vmatprep.subr.bf16.mxu0 %v744_v8  ;;  %v751_v15 = vld [vmem:[%s1016_s1 + $0x98] sm:$0xff]   ;;  %v755_v19 = vld [vmem:[%s1016_s1 + $0xa0] sm:$0xff]   ;;  %v759_v23 = vld [vmem:[%s1016_s1 + $0xa8] sm:$0xff]  }
   0x9   :  { %684 = vmatpush3.bf16.msra.mxu1 %v743_v7  ;;  %v760_v24 = vld [vmem:[%s1016_s1 + $0x70] sm:$0xff]   ;;  %v764_v28 = vld [vmem:[%s1016_s1 + $0x78] sm:$0xff]   ;;  %v17_v31 = vld [vmem:[%s1015_s0 + $0x8] sm:$0xff] }
   0xa   :  { %685 = vmatprep.subr.bf16.mxu1 %v746_v10  ;;  %v761_v25 = vld [vmem:[%s1016_s1 + $0x30] sm:$0xff]   ;;  %v765_v29 = vld [vmem:[%s1016_s1 + $0x38] sm:$0xff]   ;;  %v24_v32 = vpack.c.bf16 %v17_v31, %v17_v31  ;;  %v16_v34 = vld [vmem:[%s1015_s0] sm:$0xff] }
   0xb   :  { %664 = vmatpush3.bf16.msra.mxu0 %v745_v9  ;;  %v762_v26 = vld [vmem:[%s1016_s1 + $0xf0] sm:$0xff]   ;;  %v766_v30 = vld [vmem:[%s1016_s1 + $0xf8] sm:$0xff]   ;;  %v23_v35 = vpack.c.bf16 %v16_v34, %v16_v34  ;;  %v768_v36 = vld [vmem:[%s1016_s1 + $0x140] sm:$0xff]  }
   0xc   :  { %665 = vmatprep.subr.bf16.mxu0 %v748_v12  ;;  %v763_v27 = vld [vmem:[%s1016_s1 + $0xb0] sm:$0xff]   ;;  %v767_v33 = vld [vmem:[%s1016_s1 + $0xb8] sm:$0xff]   ;;  %465 = vmatprep.mubr.bf16.mxu0 %v24_v32  ;;  %v769_v39 = vld [vmem:[%s1016_s1 + $0x100] sm:$0xff]  }
   0xd   :  { %686 = vmatpush3.bf16.msra.mxu1 %v747_v11  ;;  %v19_v37 = vld [vmem:[%s1015_s0 + $0x18] sm:$0xff]  ;;  %v18_v40 = vld [vmem:[%s1015_s0 + $0x10] sm:$0xff]  ;;  %v770_v42 = vld [vmem:[%s1016_s1 + $0x148] sm:$0xff]  }
   0xe   :  { %687 = vmatprep.subr.bf16.mxu1 %v750_v14  ;;  %v26_v38 = vpack.c.bf16 %v19_v37, %v19_v37  ;;  %v25_v41 = vpack.c.bf16 %v18_v40, %v18_v40  ;;  %v771_v43 = vld [vmem:[%s1016_s1 + $0x108] sm:$0xff]   ;;  %v772_v45 = vld [vmem:[%s1016_s1 + $0x150] sm:$0xff]   ;;  %v774_v47 = vld [vmem:[%s1016_s1 + $0x158] sm:$0xff]  }
   0xf   :  { %666 = vmatpush3.bf16.msra.mxu0 %v749_v13  ;;  %v773_v46 = vld [vmem:[%s1016_s1 + $0x110] sm:$0xff]   ;;  %v775_v48 = vld [vmem:[%s1016_s1 + $0x118] sm:$0xff]   ;;  %v776_v49 = vld [vmem:[%s1016_s1 + $0x160] sm:$0xff]  }
  0x10   :  { %667 = vmatprep.subr.bf16.mxu0 %v752_v16  ;;  %505 = vmatprep.mubr.bf16.mxu1 %v26_v38  ;;  %v777_v50 = vld [vmem:[%s1016_s1 + $0x120] sm:$0xff]   ;;  %v778_v51 = vld [vmem:[%s1016_s1 + $0x168] sm:$0xff]   ;;  %v22_v55 = vld [vmem:[%s1015_s0 + $0x30] sm:$0xff] }
  0x11   :  { %688 = vmatpush3.bf16.msra.mxu1 %v751_v15  ;;  %v784_v52 = vld [vmem:[%s1016_s1 + $0x180] sm:$0xff]   ;;  %v21_v53 = vld [vmem:[%s1015_s0 + $0x28] sm:$0xff] }
  0x12   :  { %689 = vmatprep.subr.bf16.mxu1 %v754_v18  ;;  %v28_v54 = vpack.c.bf16 %v21_v53, %v21_v53 }
  0x13   :  { %668 = vmatpush3.bf16.msra.mxu0 %v753_v17 }
  0x14   :  { %669 = vmatprep.subr.bf16.mxu0 %v756_v20 }
  0x15   :  { %690 = vmatpush3.bf16.msra.mxu1 %v755_v19 }
  0x16   :  { %691 = vmatprep.subr.bf16.mxu1 %v758_v22 }
  0x17   :  { %670 = vmatpush3.bf16.msra.mxu0 %v757_v21 }
  0x18   :  { %671 = vmatprep.subr.bf16.mxu0 %v760_v24 }
  0x19   :  { %692 = vmatpush3.bf16.msra.mxu1 %v759_v23 }
  0x1a   :  { %693 = vmatprep.subr.bf16.mxu1 %v762_v26 }
  0x1b   :  { %672 = vmatpush3.bf16.msra.mxu0 %v761_v25 }
  0x1c   :  { %673 = vmatprep.subr.bf16.mxu0 %v764_v28 }
  0x1d   :  { %694 = vmatpush3.bf16.msra.mxu1 %v763_v27 }
  0x1e   :  { %695 = vmatprep.subr.bf16.mxu1 %v766_v30 }
  0x1f   :  { %674 = vmatpush3.bf16.msra.mxu0 %v765_v29 }
  0x20   :  { %703 = vmatprep.subr.bf16.mxu0 %v768_v36 }
  0x21   :  { %696 = vmatpush3.bf16.msra.mxu1 %v767_v33 }
  0x22   :  { %466 = vmatmul.mubr.bf16.vlgmr.msra.gmra.mrb[0].mxu0 %v23_v35  ;;  %727 = vmatprep.subr.bf16.mxu1 %v809_v44 }
  0x23   :  { %704 = vmatpush3.bf16.msra.mxu0 %v769_v39 }
  0x24   :  { %506 = vmatmul.mubr.bf16.vlgmr.msra.gmra.mrb[0].mxu1 %v25_v41  ;;  %705 = vmatprep.subr.bf16.mxu0 %v770_v42 }
  0x25   :  { %729 = vmatprep.mubr.msk.bf16.mxu1 %vm810_vm0, %v809_v44 }
  0x27   :  { %706 = vmatpush3.bf16.msra.mxu0 %v771_v43 }
  0x28   :  { %707 = vmatprep.subr.bf16.mxu0 %v772_v45 }
  0x2b   :  { %708 = vmatpush3.bf16.msra.mxu0 %v773_v46 }
  0x2c   :  { %709 = vmatprep.subr.bf16.mxu0 %v774_v47 }
  0x2f   :  { %710 = vmatpush3.bf16.msra.mxu0 %v775_v48 }
  0x30   :  { %711 = vmatprep.subr.bf16.mxu0 %v776_v49 }
  0x31   :  { %8 = vsyncpa [#allocation3], 0  ;;  %v779_v56 = vld [vmem:[%s1016_s1 + $0x128] sm:$0xff]   ;;  %728 = vmatpush3.bf16.msra.mxu1 %v784_v52  ;;  %v29_v57 = vpack.c.bf16 %v22_v55, %v22_v55  ;;  %vm429_vm1 = vcmask 130048   ;;  %v780_v58 = vld [vmem:[%s1016_s1 + $0x170] sm:$0xff]   ;;  %545 = vmatprep.mubr.bf16.mxu0 %v28_v54 }
  0x32   :  { %v781_v59 = vld [vmem:[%s1016_s1 + $0x130] sm:$0xff]   ;;  %v782_v60 = vld [vmem:[%s1016_s1 + $0x178] sm:$0xff]   ;;  %v20_v62 = vld [vmem:[%s1015_s0 + $0x20] sm:$0xff]  ;;  %s811_s0 = smov [#allocation2]  }
  0x33   :  { %712 = vmatpush3.bf16.msra.mxu0 %v777_v50  ;;  %v783_v61 = vld [vmem:[%s1016_s1 + $0x138] sm:$0xff]   ;;  %v27_v63 = vpack.c.bf16 %v20_v62, %v20_v62  ;;  %v608_v1 = vld [vmem:[%s1017_s2] ss:$0 sm:$0xff]  ;;  %s600_s1 = sshll.u32 %s811_s0, 4  ;;  %s601_s1 = int_to_ptr.vmem [resolvable:$true] %s600_s1 }
  0x34   :  { %713 = vmatprep.subr.bf16.mxu0 %v778_v51  ;;  %730 = vmatmul.mubr.msk.bf16.vlgmr.msra.gmra.mrb[4].mxu1 %vm429_vm1, %v29_v57  ;;  %s785_s2 = scalar_lea.vmem %s601_s1, 128  ;;  %p790_p1 = scmp.lt.s32.totalorder %s601_s1, %s601_s1 }
  0x35   :  { %p786_p0 = scmp.ne.s32.totalorder %s601_s1, %s785_s2  ;;  %p791_p2 = scmp.lt.s32.totalorder %s785_s2, %s785_s2 }
  0x37   :  { %714 = vmatpush3.bf16.msra.mxu0 %v779_v56  ;;  %p792_p3 = por %p791_p2, %p790_p1 }
  0x38   :  { %715 = vmatprep.subr.bf16.mxu0 %v780_v58 }
  0x39   :  { %p793_p4 = pnand %p792_p3, %p786_p0 }
  0x3b   :  { %716 = vmatpush3.bf16.msra.mxu0 %v781_v59 }
  0x3c   :  { %717 = vmatprep.subr.bf16.mxu0 %v782_v60 }
  0x3f   :  { %718 = vmatpush3.bf16.msra.mxu0 %v783_v61 }
  0x42   :  { %546 = vmatmul.mubr.bf16.vlgmr.msra.gmra.mrb[4].mxu0 %v27_v63 }
  0xf5   :  { %v675_v0 = vpop.f32.mrb[0].mxu0 }
  0xf6   :  { %v676_v2 = vpop.f32.mrb[1].mxu0 }
  0xf7   :  { %v677_v3 = vadd.f32 %v676_v2, %v675_v0  ;;  %v678_v4 = vpop.f32.mrb[2].mxu0  ;;  %v697_v5 = vpop.f32.mrb[0].mxu1 }
  0xf8   :  { %v679_v6 = vpop.f32.mrb[3].mxu0  ;;  %v698_v8 = vpop.f32.mrb[1].mxu1 }
  0xf9   :  { %v468_v7 = vadd.f32 %v677_v3, %v608_v1  ;;  %v699_v9 = vadd.f32 %v698_v8, %v697_v5  ;;  %v700_v10 = vpop.f32.mrb[2].mxu1 }
  0xfa   :  { %v701_v11 = vpop.f32.mrb[3].mxu1 }
  0xfb   :  { %v508_v12 = vadd.f32 %v699_v9, %v468_v7 }
 0x107   :  { %v587_v13 = vpop.f32.mrb[4].mxu1 }
 0x108   :  { %v731_v14 = vpop.f32.mrb[5].mxu1 }
 0x109   :  { %v590_v15 = vpop.f32.mrb[6].mxu1 }
 0x10a   :  { %v732_v16 = vpop.f32.mrb[7].mxu1 }
 0x115   :  { %v719_v17 = vpop.f32.mrb[4].mxu0 }
 0x116   :  { %v720_v18 = vpop.f32.mrb[5].mxu0 }
 0x117   :  { %v721_v19 = vadd.f32 %v720_v18, %v719_v17  ;;  %v722_v20 = vpop.f32.mrb[6].mxu0 }
 0x118   :  { %v723_v21 = vpop.f32.mrb[7].mxu0 }
 0x119   :  { %v548_v22 = vadd.f32 %v721_v19, %v508_v12 }
 0x11b   :  { %v588_v23 = vadd.f32 %v587_v13, %v548_v22 }
 0x11d   :  { %593 = vst [vmem:[#allocation2] sm:$0xff] %v588_v23 }
 0x11e   :  { %796 = shalt.err (!%p793_p4)
}
 0x11f   :  { %s797_s20 = scalar_lea.hbm %s1018_s3, 128 }
 0x120   :  { %p798_p5 = scmp.ne.s32.totalorder %s1018_s3, %s797_s20  ;;  %p801_p6 = scmp.lt.u32.totalorder %s797_s20, %s1018_s3 }
 0x122   :  { %p803_p7 = pnand %p801_p6, %p798_p5 }
 0x124   :  { %806 = shalt.err (!%p803_p7)
}
 0x125   :  { %603 = dma.vmem_to_hbm [thread:$0]  %s601_s1, 128, %s1018_s3, [#allocation3]  }
 0x126   :  { %807 = dma.done.wait [#allocation3], 128  }
 0x127   :  { %808 = vsyncadd [#allocation3], 4294967168 }
 0x128   :  { %607 = vsyncpa [#allocation3], 1 }

</bundles_post_ra>
